<compile_context>
chip_gen: v7x
topology: tpu7x:2x2x1
jax: 0.10.0
libtpu: 0.0.40
codegen_flags: <defaults>
</compile_context>

<pallas_src>
import jax
import jax.numpy as jnp
from jax.experimental import pallas as pl
from jax.experimental.pallas import tpu as pltpu


def _round_up(n, m):
    return ((n + m - 1) // m) * m


def encoder_kernel(x_ref, w_in_ref, b_in_ref, w_h_ref, b_h_ref,
                   w_head_ref, b_head_ref, eps_ref, out_ref):
    L = eps_ref.shape[-1]  # true latent dim

    # layer 1: relu(x @ W_in + b_in)   (x already bf16, f32 accumulate)
    h1 = jnp.dot(x_ref[...], w_in_ref[...],
                 preferred_element_type=jnp.float32) + b_in_ref[...]
    h1 = jnp.maximum(h1, 0.0)

    # layer 2: tanh(h1 @ W_h + b_h)    (elementwise kept in f32 -> v5e-safe)
    h = jnp.dot(h1.astype(jnp.bfloat16), w_h_ref[...],
                preferred_element_type=jnp.float32) + b_h_ref[...]
    h = jnp.tanh(h)

    # fused heads: one matmul producing [mean | log_var] at true latent width
    head = jnp.dot(h.astype(jnp.bfloat16), w_head_ref[...],
                   preferred_element_type=jnp.float32) + b_head_ref[...]
    mean = head[:, :L]
    log_var = head[:, L:2 * L]

    # reparameterization: z = mean + eps * exp(0.5 * log_var)
    std = jnp.exp(0.5 * log_var)
    z = mean + eps_ref[...] * std

    # packed output [z | mean | log_var] at true latent width (var recomputed
    # in the wrapper -> 25% less writeback); zero the padding lanes once.
    out_ref[...] = jnp.zeros_like(out_ref)
    out_ref[:, 0 * L:1 * L] = z
    out_ref[:, 1 * L:2 * L] = mean
    out_ref[:, 2 * L:3 * L] = log_var


def encoder_forward(x, params, eps, *, batch_tile=256):
    """Fused VAE-encoder forward.

    x:      (B, input_dim) float32
    params: dict of pre-transposed weights (in, out) and 2-D biases (1, out), f32
    eps:    (B, latent_dim) float32 standard-normal noise
    Returns (z, mean, var, log_var), each (B, latent_dim) float32.
    """
    B, input_dim = x.shape
    hidden_dim = params["w_in"].shape[1]
    latent_dim = params["w_mu"].shape[1]

    f32, bf16 = jnp.float32, jnp.bfloat16

    # Hidden dim padded to 128 lanes (it is both a matmul-N and matmul-K dim);
    # input/latent dims stay at true width (block last-dim == full array dim).
    hp = _round_up(hidden_dim, 128)
    out_cols = _round_up(3 * latent_dim, 128)

    # Batch tile: as large as batch_tile allows, but keep >= 2 grid steps when
    # possible (software pipelining + v7x 2-TensorCore sharding).
    tb = max(8, min(batch_tile, _round_up(pl.cdiv(B, 2), 8)))
    bp = _round_up(B, tb)

    def pad2(a, rows, cols, dtype):
        return jnp.pad(a, ((0, rows - a.shape[0]), (0, cols - a.shape[1]))).astype(dtype)

    w_in = pad2(params["w_in"], input_dim, hp, bf16)          # (input_dim, hp)
    b_in = pad2(params["b_in"], 1, hp, f32)                   # (1, hp)
    w_h = pad2(params["w_h"], hp, hp, bf16)                   # (hp, hp)
    b_h = pad2(params["b_h"], 1, hp, f32)                     # (1, hp)
    # fused mu / log_var head at true latent width: (hp, 2*L), (1, 2*L)
    w_head = jnp.concatenate([pad2(params["w_mu"], hp, latent_dim, bf16),
                              pad2(params["w_lv"], hp, latent_dim, bf16)], axis=1)
    b_head = jnp.concatenate([params["b_mu"].astype(f32),
                              params["b_lv"].astype(f32)], axis=1)

    x_p = pad2(x, bp, input_dim, bf16)                        # bf16 input stream
    eps_p = pad2(eps, bp, latent_dim, f32)                    # f32 for exact parity

    grid = (bp // tb,)
    tile_map = lambda i: (i, 0)    # batch-tiled operands
    const_map = lambda i: (0, 0)   # weights/biases: resident, block-invariant

    # Explicit VMEM budget: weights (+ double buffer) + double-buffered tiles
    # + 4 MiB headroom, clamped to [16 MiB, 64 MiB] so it is v5e/v6e/v7x safe.
    def _nbytes(a):
        return int(a.size) * a.dtype.itemsize
    weight_bytes = sum(_nbytes(a) for a in (w_in, b_in, w_h, b_h, w_head, b_head))
    tile_bytes = tb * input_dim * 2 + tb * latent_dim * 4 + tb * out_cols * 4
    vmem_limit = int(min(max(2 * (weight_bytes + tile_bytes) + (4 << 20), 16 << 20),
                         64 << 20))

    out = pl.pallas_call(
        encoder_kernel,
        out_shape=jax.ShapeDtypeStruct((bp, out_cols), jnp.float32),
        grid_spec=pltpu.PrefetchScalarGridSpec(
            num_scalar_prefetch=0,
            grid=grid,
            in_specs=[
                pl.BlockSpec((tb, input_dim), tile_map),           # x (bf16)
                pl.BlockSpec((input_dim, hp), const_map),          # w_in (bf16)
                pl.BlockSpec((1, hp), const_map),                  # b_in
                pl.BlockSpec((hp, hp), const_map),                 # w_h  (bf16)
                pl.BlockSpec((1, hp), const_map),                  # b_h
                pl.BlockSpec((hp, 2 * latent_dim), const_map),     # w_head = [w_mu | w_lv]
                pl.BlockSpec((1, 2 * latent_dim), const_map),      # b_head
                pl.BlockSpec((tb, latent_dim), tile_map),          # eps (f32)
            ],
            out_specs=pl.BlockSpec((tb, out_cols), tile_map),
        ),
        compiler_params=pltpu.CompilerParams(
            dimension_semantics=("parallel",),
            vmem_limit_bytes=vmem_limit),
    )(x_p, w_in, b_in, w_h, b_h, w_head, b_head, eps_p)

    # unpack the packed slab (true latent width) and drop batch padding
    L = latent_dim
    z = out[:B, 0 * L:1 * L]
    mean = out[:B, 1 * L:2 * L]
    log_var = out[:B, 2 * L:3 * L]
    var = jnp.exp(0.5 * log_var)   # recomputed here instead of stored by kernel
    return z, mean, var, log_var


def init_params(key, input_dim, hidden_dim, latent_dim):
    """Deterministic init mirroring nn.Linear default (uniform ±1/sqrt(fan_in)).

    Weights stored pre-transposed as (in_features, out_features); biases as (1, out).
    """
    ks = jax.random.split(key, 8)

    def linear(kw, kb, fan_in, fan_out):
        bound = 1.0 / jnp.sqrt(fan_in)
        w = jax.random.uniform(kw, (fan_in, fan_out), jnp.float32, -bound, bound)
        b = jax.random.uniform(kb, (1, fan_out), jnp.float32, -bound, bound)
        return w, b

    w_in, b_in = linear(ks[0], ks[1], input_dim, hidden_dim)
    w_h, b_h = linear(ks[2], ks[3], hidden_dim, hidden_dim)
    w_mu, b_mu = linear(ks[4], ks[5], hidden_dim, latent_dim)
    w_lv, b_lv = linear(ks[6], ks[7], hidden_dim, latent_dim)
    return dict(w_in=w_in, b_in=b_in, w_h=w_h, b_h=b_h,
                w_mu=w_mu, b_mu=b_mu, w_lv=w_lv, b_lv=b_lv)


def encoder_reference(x, params, eps):
    """Plain-JAX reference using the same bf16-weight / f32-accumulate math."""
    bf = jnp.bfloat16

    def mm(a, w):
        return jnp.dot(a.astype(bf), w.astype(bf), preferred_element_type=jnp.float32)

    h1 = jnp.maximum(mm(x, params["w_in"]) + params["b_in"], 0.0)
    h = jnp.tanh(mm(h1, params["w_h"]) + params["b_h"])
    mean = mm(h, params["w_mu"]) + params["b_mu"]
    log_var = mm(h, params["w_lv"]) + params["b_lv"]
    var = jnp.exp(0.5 * log_var)
    z = mean + eps * var
    return z, mean, var, log_var


if __name__ == "__main__":
    # Small demo shapes; tb=128 -> 2-step pipelined grid (megacore-shardable).
    B, input_dim, hidden_dim, latent_dim = 256, 16, 32, 8

    key = jax.random.PRNGKey(0)
    k_params, k_x, k_eps = jax.random.split(key, 3)

    params = init_params(k_params, input_dim, hidden_dim, latent_dim)
    x = jax.random.normal(k_x, (B, input_dim), dtype=jnp.float32)
    eps = jax.random.normal(k_eps, (B, latent_dim), dtype=jnp.float32)

    z, mean, var, log_var = encoder_forward(x, params, eps)
    jax.block_until_ready((z, mean, var, log_var))

    # Sanity check against a plain-JAX reference (same bf16 matmul math).
    z_r, mean_r, var_r, lv_r = encoder_reference(x, params, eps)
    assert jnp.allclose(z, z_r, atol=1e-3, rtol=1e-3)
    assert jnp.allclose(mean, mean_r, atol=1e-3, rtol=1e-3)
    assert jnp.allclose(var, var_r, atol=1e-3, rtol=1e-3)
    assert jnp.allclose(log_var, lv_r, atol=1e-3, rtol=1e-3)

    print("KERNEL_OK")
</pallas_src>

<mosaic_0001>
module attributes {stable_mosaic.version = 11 : i64} {
  func.func @encoder_kernel(%arg0: i32, %arg1: memref<128x16xbf16, #tpu.memory_space<vmem>>, %arg2: memref<16x128xbf16, #tpu.memory_space<vmem>>, %arg3: memref<1x128xf32, #tpu.memory_space<vmem>>, %arg4: memref<128x128xbf16, #tpu.memory_space<vmem>>, %arg5: memref<1x128xf32, #tpu.memory_space<vmem>>, %arg6: memref<128x16xbf16, #tpu.memory_space<vmem>>, %arg7: memref<1x16xf32, #tpu.memory_space<vmem>>, %arg8: memref<128x8xf32, #tpu.memory_space<vmem>>, %arg9: memref<128x128xf32, #tpu.memory_space<vmem>>) attributes {dimension_semantics = [#tpu.dimension_semantics<parallel>], iteration_bounds = array<i64: 2>, scalar_prefetch = 0 : i64, scratch_operands = 0 : i64, tpu.core_type = #tpu.core_type<tc>, window_params = [{transform_indices = @transform_0, window_bounds = array<i64: 128, 16>}, {pipeline_mode = #tpu.pipeline_mode<synchronous>, transform_indices = @transform_1, window_bounds = array<i64: 16, 128>}, {pipeline_mode = #tpu.pipeline_mode<synchronous>, transform_indices = @transform_2, window_bounds = array<i64: 1, 128>}, {pipeline_mode = #tpu.pipeline_mode<synchronous>, transform_indices = @transform_3, window_bounds = array<i64: 128, 128>}, {pipeline_mode = #tpu.pipeline_mode<synchronous>, transform_indices = @transform_4, window_bounds = array<i64: 1, 128>}, {pipeline_mode = #tpu.pipeline_mode<synchronous>, transform_indices = @transform_5, window_bounds = array<i64: 128, 16>}, {pipeline_mode = #tpu.pipeline_mode<synchronous>, transform_indices = @transform_6, window_bounds = array<i64: 1, 16>}, {transform_indices = @transform_7, window_bounds = array<i64: 128, 8>}, {transform_indices = @transform_8, window_bounds = array<i64: 128, 128>}]} {
    %c0 = arith.constant 0 : index
    %c0_0 = arith.constant 0 : index
    %0 = vector.load %arg1[%c0, %c0_0] : memref<128x16xbf16, #tpu.memory_space<vmem>>, vector<128x16xbf16>
    %c0_1 = arith.constant 0 : index
    %c0_2 = arith.constant 0 : index
    %1 = vector.load %arg2[%c0_1, %c0_2] : memref<16x128xbf16, #tpu.memory_space<vmem>>, vector<16x128xbf16>
    %cst = arith.constant dense<0.000000e+00> : vector<128x128xf32>
    %2 = tpu.matmul %0, %1, %cst {dimension_numbers = #tpu.dot_dimension_numbers<[1], [0], [0], [1], [0, 0, 1, 1], [], []>} : vector<128x16xbf16>, vector<16x128xbf16>, vector<128x128xf32> -> vector<128x128xf32>
    %c0_3 = arith.constant 0 : index
    %c0_4 = arith.constant 0 : index
    %3 = vector.load %arg3[%c0_3, %c0_4] : memref<1x128xf32, #tpu.memory_space<vmem>>, vector<1x128xf32>
    %4 = vector.broadcast %3 : vector<1x128xf32> to vector<128x128xf32>
    %5 = arith.addf %2, %4 : vector<128x128xf32>
    %cst_5 = arith.constant 0.000000e+00 : f32
    %6 = vector.broadcast %cst_5 : f32 to vector<128x128xf32>
    %7 = arith.maximumf %5, %6 : vector<128x128xf32>
    %8 = arith.truncf %7 : vector<128x128xf32> to vector<128x128xbf16>
    %c0_6 = arith.constant 0 : index
    %c0_7 = arith.constant 0 : index
    %9 = vector.load %arg4[%c0_6, %c0_7] : memref<128x128xbf16, #tpu.memory_space<vmem>>, vector<128x128xbf16>
    %cst_8 = arith.constant dense<0.000000e+00> : vector<128x128xf32>
    %10 = tpu.matmul %8, %9, %cst_8 {dimension_numbers = #tpu.dot_dimension_numbers<[1], [0], [0], [1], [0, 0, 1, 1], [], []>} : vector<128x128xbf16>, vector<128x128xbf16>, vector<128x128xf32> -> vector<128x128xf32>
    %c0_9 = arith.constant 0 : index
    %c0_10 = arith.constant 0 : index
    %11 = vector.load %arg5[%c0_9, %c0_10] : memref<1x128xf32, #tpu.memory_space<vmem>>, vector<1x128xf32>
    %12 = vector.broadcast %11 : vector<1x128xf32> to vector<128x128xf32>
    %13 = arith.addf %10, %12 : vector<128x128xf32>
    %14 = math.tanh %13 : vector<128x128xf32>
    %15 = arith.truncf %14 : vector<128x128xf32> to vector<128x128xbf16>
    %c0_11 = arith.constant 0 : index
    %c0_12 = arith.constant 0 : index
    %16 = vector.load %arg6[%c0_11, %c0_12] : memref<128x16xbf16, #tpu.memory_space<vmem>>, vector<128x16xbf16>
    %cst_13 = arith.constant dense<0.000000e+00> : vector<128x16xf32>
    %17 = tpu.matmul %15, %16, %cst_13 {dimension_numbers = #tpu.dot_dimension_numbers<[1], [0], [0], [1], [0, 0, 1, 1], [], []>} : vector<128x128xbf16>, vector<128x16xbf16>, vector<128x16xf32> -> vector<128x16xf32>
    %c0_14 = arith.constant 0 : index
    %c0_15 = arith.constant 0 : index
    %18 = vector.load %arg7[%c0_14, %c0_15] : memref<1x16xf32, #tpu.memory_space<vmem>>, vector<1x16xf32>
    %19 = vector.broadcast %18 : vector<1x16xf32> to vector<128x16xf32>
    %20 = arith.addf %17, %19 : vector<128x16xf32>
    %21 = vector.extract_strided_slice %20 {offsets = [0, 0], sizes = [128, 8], strides = [1, 1]} : vector<128x16xf32> to vector<128x8xf32>
    %22 = vector.extract_strided_slice %20 {offsets = [0, 8], sizes = [128, 8], strides = [1, 1]} : vector<128x16xf32> to vector<128x8xf32>
    %cst_16 = arith.constant 5.000000e-01 : f32
    %23 = vector.broadcast %cst_16 : f32 to vector<128x8xf32>
    %24 = arith.mulf %23, %22 : vector<128x8xf32>
    %25 = math.exp %24 : vector<128x8xf32>
    %c0_17 = arith.constant 0 : index
    %c0_18 = arith.constant 0 : index
    %26 = vector.load %arg8[%c0_17, %c0_18] : memref<128x8xf32, #tpu.memory_space<vmem>>, vector<128x8xf32>
    %27 = arith.mulf %26, %25 : vector<128x8xf32>
    %28 = arith.addf %21, %27 : vector<128x8xf32>
    %cst_19 = arith.constant 0.000000e+00 : f32
    %29 = vector.broadcast %cst_19 : f32 to vector<128x128xf32>
    %c0_20 = arith.constant 0 : index
    %c0_21 = arith.constant 0 : index
    %30 = vector.load %arg9[%c0_20, %c0_21] : memref<128x128xf32, #tpu.memory_space<vmem>>, vector<128x128xf32>
    tpu.vector_store %arg9[%c0_20, %c0_21], %29 {strides = array<i32>} : memref<128x128xf32, #tpu.memory_space<vmem>>, vector<128x128xf32>,
    %c0_22 = arith.constant 0 : index
    %c0_23 = arith.constant 0 : index
    %31 = vector.load %arg9[%c0_22, %c0_23] : memref<128x128xf32, #tpu.memory_space<vmem>>, vector<128x8xf32>
    tpu.vector_store %arg9[%c0_22, %c0_23], %28 {strides = array<i32>} : memref<128x128xf32, #tpu.memory_space<vmem>>, vector<128x8xf32>,
    %c0_24 = arith.constant 0 : index
    %c8 = arith.constant 8 : index
    %32 = vector.load %arg9[%c0_24, %c8] : memref<128x128xf32, #tpu.memory_space<vmem>>, vector<128x8xf32>
    tpu.vector_store %arg9[%c0_24, %c8], %21 {strides = array<i32>} : memref<128x128xf32, #tpu.memory_space<vmem>>, vector<128x8xf32>,
    %c0_25 = arith.constant 0 : index
    %c16 = arith.constant 16 : index
    %33 = vector.load %arg9[%c0_25, %c16] : memref<128x128xf32, #tpu.memory_space<vmem>>, vector<128x8xf32>
    tpu.vector_store %arg9[%c0_25, %c16], %22 {strides = array<i32>} : memref<128x128xf32, #tpu.memory_space<vmem>>, vector<128x8xf32>,
    return
  }
  func.func @transform_0(%arg0: i32) -> (i32, i32) {
    %c0_i32 = arith.constant 0 : i32
    %c0_i32_0 = arith.constant 0 : i32
    return %arg0, %c0_i32 : i32, i32
  }
  func.func @transform_1(%arg0: i32) -> (i32, i32) {
    %c0_i32 = arith.constant 0 : i32
    %c0_i32_0 = arith.constant 0 : i32
    %c0_i32_1 = arith.constant 0 : i32
    return %c0_i32, %c0_i32_0 : i32, i32
  }
  func.func @transform_2(%arg0: i32) -> (i32, i32) {
    %c0_i32 = arith.constant 0 : i32
    %c0_i32_0 = arith.constant 0 : i32
    %c0_i32_1 = arith.constant 0 : i32
    return %c0_i32, %c0_i32_0 : i32, i32
  }
  func.func @transform_3(%arg0: i32) -> (i32, i32) {
    %c0_i32 = arith.constant 0 : i32
    %c0_i32_0 = arith.constant 0 : i32
    %c0_i32_1 = arith.constant 0 : i32
    return %c0_i32, %c0_i32_0 : i32, i32
  }
  func.func @transform_4(%arg0: i32) -> (i32, i32) {
    %c0_i32 = arith.constant 0 : i32
    %c0_i32_0 = arith.constant 0 : i32
    %c0_i32_1 = arith.constant 0 : i32
    return %c0_i32, %c0_i32_0 : i32, i32
  }
  func.func @transform_5(%arg0: i32) -> (i32, i32) {
    %c0_i32 = arith.constant 0 : i32
    %c0_i32_0 = arith.constant 0 : i32
    %c0_i32_1 = arith.constant 0 : i32
    return %c0_i32, %c0_i32_0 : i32, i32
  }
  func.func @transform_6(%arg0: i32) -> (i32, i32) {
    %c0_i32 = arith.constant 0 : i32
    %c0_i32_0 = arith.constant 0 : i32
    %c0_i32_1 = arith.constant 0 : i32
    return %c0_i32, %c0_i32_0 : i32, i32
  }
  func.func @transform_7(%arg0: i32) -> (i32, i32) {
    %c0_i32 = arith.constant 0 : i32
    %c0_i32_0 = arith.constant 0 : i32
    return %arg0, %c0_i32 : i32, i32
  }
  func.func @transform_8(%arg0: i32) -> (i32, i32) {
    %c0_i32 = arith.constant 0 : i32
    %c0_i32_0 = arith.constant 0 : i32
    return %arg0, %c0_i32 : i32, i32
  }
}

</mosaic_0001>

<bundles_post_ra>
// kernel: tpu_custom_call.1
= control target key start
LH: loop header
LB: loop body
LE: loop exit
PB: predicated region body
PF: predicated region fallthrough
CT: control target
= control target key end

     0   :  { %13 = vsyncpa [#allocation3], 0  ;;  %s2175_s0 = inlined_call_operand.vmem [shape: bf16[256,16], index: 0, kind: input, shape index: {}]   ;;  %s2176_s1 = inlined_call_operand.vmem [shape: bf16[16,128], index: 1, kind: input, shape index: {}]   ;;  %s2177_s2 = inlined_call_operand.vmem [shape: f32[1,128], index: 2, kind: input, shape index: {}]   ;;  %s2178_s3 = inlined_call_operand.vmem [shape: bf16[128,128], index: 3, kind: input, shape index: {}]   ;;  %s2179_s4 = inlined_call_operand.vmem [shape: f32[1,128], index: 4, kind: input, shape index: {}]   ;;  %s2180_s5 = inlined_call_operand.vmem [shape: bf16[128,16], index: 5, kind: input, shape index: {}]   ;;  %s2181_s6 = inlined_call_operand.vmem [shape: f32[1,16], index: 6, kind: input, shape index: {}]   ;;  %s2182_s7 = inlined_call_operand.vmem [shape: f32[256,8], index: 7, kind: input, shape index: {}]   ;;  %s2183_s8 = inlined_call_operand.hbm [shape: f32[256,128], index: 8, kind: output, shape index: {}]  }
   0x1   :  { %15 = vsyncpa [#allocation3 + $0x1], 0  ;;  %s1706_s27 = smov 0   ;;  %s1708_s28 = smov 0  }
   0x2   :  { %s1710_s29 = smov 0   ;;  %s1712_s30 = smov 0  }
   0x3 LB: > { %s1727_s9 = sadd.s32 4294967295, %s1654_s30   ;;  %s1286_s10 = sadd.s32 4294967294, %s1654_s30   ;;  %s1654_s30 = sphi %s1712_s30, %s2189_s30   ;;  %s1650_s29 = sphi %s1710_s29, %s2188_s29   ;;  %s1646_s28 = sphi %s1708_s28, %s2187_s28   ;;  %s1642_s27 = sphi %s1706_s27, %s2186_s27  }
   0x4   : > { %s1731_s11 = sadd.s32 1, %s1654_s30   ;;  %s206_s12 = sadd.s32 1, %s1650_s29 }
   0x5   : > { %s203_s13 = ssub.s32 %s1654_s30, %s1731_s11  ;;  %p216_p0 = scmp.ne.s32.totalorder %s1650_s29, %s1646_s28 }
   0x6   : > { %p204_p1 = scmp.eq.s32.totalorder %s203_s13, 0  ;;  %p217_p2 = scmp.eq.s32.totalorder %s1727_s9, 1 }
   0x7   : > { %p222_p3 = scmp.ne.s32.totalorder %s1646_s28, %s1642_s27  ;;  %p223_p4 = scmp.eq.s32.totalorder %s1286_s10, 1 }
   0x8   : > { %s1742_s14 = scalar_select %p204_p1, %s1650_s29, %s206_s12  }
   0x9   : > { %p1744_p5 = por %p217_p2, %p216_p0  ;;  %p1748_p6 = por %p223_p4, %p222_p3 }
   0xa   : > { %p1289_p7 = scmp.ge.s32.totalorder %s1654_s30, 1  ;;  %p277_p8 = scmp.lt.s32.totalorder %s1654_s30, 3 }
   0xc   : > { %p278_p9 = pnand %p1289_p7, %p277_p8 }
   0xd   : > { %v1503_v0 = vld [vmem:[%s2176_s1] sm:$0xff] (!%p278_p9)   ;;  %s1291_s19 = sshll.u32 (!%p278_p9), %s1727_s9, 4  ;;  %v1513_v2 = vld [vmem:[%s2178_s3 + $0x8] sm:$0xff] (!%p278_p9)   ;;  %vm401_vm0 = vcmask (!%p278_p9), 130048   ;;  %v1514_v3 = vld [vmem:[%s2178_s3 + $0x10] sm:$0xff] (!%p278_p9)   ;;  %s1656_s26 = smov (!%p278_p9), 8  }
   0xe   : > { %281 = sbr.rel (%p278_p9) target bundleno = 886 (0x376), region = 52  ;;  %p317_p10 = scmp.lt.s32.totalorder (!%p278_p9), %s1291_s19, 31  ;;  %1378 = vmatprep.subr.bf16.mxu0 (!%p278_p9), %v1503_v0  ;;  %v1512_v1 = vld [vmem:[%s2178_s3] sm:$0xff] (!%p278_p9)   ;;  %v1515_v7 = vld [vmem:[%s2178_s3 + $0x18] sm:$0xff] (!%p278_p9)   ;;  %v1517_v11 = vld [vmem:[%s2178_s3 + $0x28] sm:$0xff] (!%p278_p9)   ;;  %vm1083_vm1 = vcmask (!%p278_p9), 64512  }
   0xf   : > { %1379 = vmatpush3.bf16.msra.mxu0 (!%p278_p9), %v1503_v0  ;;  %1396 = vmatprep.subr.bf16.mxu1 (!%p278_p9), %v1512_v1  ;;  %v1516_v8 = vld [vmem:[%s2178_s3 + $0x20] sm:$0xff] (!%p278_p9)   ;;  %v1518_v15 = vld [vmem:[%s2178_s3 + $0x30] sm:$0xff] (!%p278_p9)   ;;  %v1519_v16 = vld [vmem:[%s2178_s3 + $0x38] sm:$0xff] (!%p278_p9)   ;;  %s313_s12 = sand.u32 (!%p278_p9), 1, %s1646_s28   ;;  %s1658_s18 = smov (!%p278_p9), 120   ;;  %vm1164_vm2 = vcmask (!%p278_p9), 130112  }
  0x10   : > { %1397 = vmatpush3.bf16.msra.mxu1 (!%p278_p9), %v1512_v1  ;;  %v1520_v17 = vld [vmem:[%s2180_s5] sm:$0xff] (!%p278_p9)   ;;  %v1521_v18 = vld [vmem:[%s2180_s5 + $0x8] sm:$0xff] (!%p278_p9)   ;;  %v1522_v19 = vld [vmem:[%s2180_s5 + $0x10] sm:$0xff] (!%p278_p9)   ;;  %s1290_s13 = sshll.u32 (!%p278_p9), %s313_s12, 7  ;;  %vm1181_vm3 = vcmask (!%p278_p9), 195712  }
  0x11   : > { %1398 = vmatprep.subr.bf16.mxu1 (!%p278_p9), %v1513_v2  ;;  %1428 = vmatprep.subr.bf16.mxu0 (!%p278_p9), %v1520_v17  ;;  %v1523_v20 = vld [vmem:[%s2180_s5 + $0x18] sm:$0xff] (!%p278_p9)   ;;  %v1295_v21 = vld [vmem:[%s2177_s2] ss:$0 sm:$0xff] (!%p278_p9)  ;;  %s1855_s17 = scalar_lea.vmem (!%p278_p9), [#allocation2], %s1290_s13 }
  0x12   : > { %s1212_s23 = sshll.u32 (!%p278_p9), %s1855_s17, 4  ;;  %s2125_s23 = int_to_ptr.vmem [resolvable:$true] %s1212_s23 }
  0x14   : > { %1399 = vmatpush3.bf16.msra.mxu1 (!%p278_p9), %v1513_v2 }
  0x15   : > { %s2191_s19 = smov (!%p317_p10, %s1291_s19), 31  ;;  %1400 = vmatprep.subr.bf16.mxu1 %v1514_v3 }
  0x16   : > { %s1292_s24 = sshll.u32 %s2191_s19, 2 }
  0x17   : > { %s320_s10 = scalar_lea.vmem %s2175_s0, %s1292_s24 }
  0x18   : > { %v1504_v4 = vld [vmem:[%s320_s10] sm:$0xff]   ;;  %v1505_v5 = vld [vmem:[%s320_s10 + $0x8] sm:$0xff]   ;;  %v1506_v6 = vld [vmem:[%s320_s10 + $0x10] sm:$0xff]   ;;  %1401 = vmatpush3.bf16.msra.mxu1 %v1514_v3 }
  0x19   : > { %1380 = vmatprep.mubr.msk.bf16.mxu0 %vm401_vm0, %v1504_v4  ;;  %v1507_v9 = vld [vmem:[%s320_s10 + $0x18] sm:$0xff]   ;;  %1402 = vmatprep.subr.bf16.mxu1 %v1515_v7  ;;  %v1508_v10 = vld [vmem:[%s320_s10 + $0x20] sm:$0xff]   ;;  %v1509_v12 = vld [vmem:[%s320_s10 + $0x28] sm:$0xff]  }
  0x1a   : > { %1381 = vmatmul.mubr.msk.bf16.vlgmr.msra.gmra.mrb[0].mxu0 %vm401_vm0, %v1505_v5  ;;  %v1510_v13 = vld [vmem:[%s320_s10 + $0x30] sm:$0xff]   ;;  %v1511_v14 = vld [vmem:[%s320_s10 + $0x38] sm:$0xff]   ;;  %s1294_s10 = sshll.u32 %s2191_s19, 3  ;;  %s1336_s19 = sshll.u32 %s1727_s9, 11 }
  0x1b   : > { %1384 = vmatprep.mubr.msk.bf16.mxu0 %vm401_vm0, %v1506_v6  ;;  %1429 = vmatpush3.bf16.msra.mxu0 %v1520_v17  ;;  %v1527_v17 = vld [vmem:[%s2180_s5 + $0x38] sm:$0xff]   ;;  %s1968_s22 = scalar_lea.vmem %s2182_s7, %s1294_s10  ;;  %s2121_s13 = scalar_lea.hbm %s2183_s8, %s1336_s19 }
  0x1c   : > { %1403 = vmatpush3.bf16.msra.mxu1 %v1515_v7  ;;  %1430 = vmatprep.subr.bf16.mxu0 %v1521_v18  ;;  %s2133_s9 = scalar_lea.sflag [#allocation3], %s313_s12  ;;  %s1659_s10 = smov [#allocation2]  }
  0x1d   : > { %1404 = vmatprep.subr.bf16.mxu1 %v1516_v8  ;;  %s1596_s20 = sshll.u32 %s1659_s10, 4  ;;  %s1597_s20 = int_to_ptr.vmem [resolvable:$false] %s1596_s20 }
  0x1e   : > { %s1598_s21 = scalar_lea.vmem %s1597_s20, 4096  ;;  %p1599_p0 = scmp.lt.s32.totalorder %s2125_s23, %s1597_s20 }
  0x1f   : > { %1431 = vmatpush3.bf16.msra.mxu0 %v1521_v18  ;;  %v1313_v18 = vld [vmem:[%s2179_s4] ss:$0 sm:$0xff] }
  0x20   : > { %1405 = vmatpush3.bf16.msra.mxu1 %v1516_v8  ;;  %1432 = vmatprep.subr.bf16.mxu0 %v1522_v19 }
  0x21   : > { %1406 = vmatprep.subr.bf16.mxu1 %v1517_v11 }
  0x22   : > { %1385 = vmatmul.mubr.msk.bf16.gmra.mrb[4].mxu0 %vm401_vm0, %v1507_v9 }
  0x23   : > { %1388 = vmatprep.mubr.msk.bf16.mxu0 %vm401_vm0, %v1508_v10  ;;  %1433 = vmatpush3.bf16.msra.mxu0 %v1522_v19 }
  0x24   : > { %1407 = vmatpush3.bf16.msra.mxu1 %v1517_v11  ;;  %1434 = vmatprep.subr.bf16.mxu0 %v1523_v20 }
  0x25   : > { %1408 = vmatprep.subr.bf16.mxu1 %v1518_v15 }
  0x27   : > { %1435 = vmatpush3.bf16.msra.mxu0 %v1523_v20 }
  0x28   : > { %1409 = vmatpush3.bf16.msra.mxu1 %v1518_v15  ;;  %v1525_v15 = vld [vmem:[%s2180_s5 + $0x28] sm:$0xff]  }
  0x29   : > { %1410 = vmatprep.subr.bf16.mxu1 %v1519_v16 }
  0x2a   : > { %1389 = vmatmul.mubr.msk.bf16.gmra.mrb[8].mxu0 %vm401_vm0, %v1509_v12 }
  0x2b   : > { %1392 = vmatprep.mubr.msk.bf16.mxu0 %vm401_vm0, %v1510_v13 }
  0x2c   : > { %1411 = vmatpush3.bf16.msra.mxu1 %v1519_v16  ;;  %v1526_v16 = vld [vmem:[%s2180_s5 + $0x30] sm:$0xff]  }
  0x32   : > { %1393 = vmatmul.mubr.msk.bf16.gmra.mrb[12].mxu0 %vm401_vm0, %v1511_v14  ;;  %v1524_v14 = vld [vmem:[%s2180_s5 + $0x20] sm:$0xff]  }
  0x33   : > { %1436 = vmatprep.subr.bf16.mxu0 %v1524_v14 }
  0x34   : > { %1437 = vmatpush3.bf16.msra.mxu0 %v1524_v14 }
  0x35   : > { %1438 = vmatprep.subr.bf16.mxu0 %v1525_v15 }
  0x38   : > { %1439 = vmatpush3.bf16.msra.mxu0 %v1525_v15 }
  0x39   : > { %1440 = vmatprep.subr.bf16.mxu0 %v1526_v16 }
  0x3c   : > { %1441 = vmatpush3.bf16.msra.mxu0 %v1526_v16 }
  0x3d   : > { %1442 = vmatprep.subr.bf16.mxu0 %v1527_v17 }
  0x40   : > { %1443 = vmatpush3.bf16.msra.mxu0 %v1527_v17 }
  0xed   : > { %v1382_v22 = vpop.f32.mrb[0].mxu0 }
  0xee   : > { %v469_v23 = vadd.f32 %v1382_v22, %v1295_v21  ;;  %v460_v24 = vpop.f32.mrb[1].mxu0 }
  0xef   : > { %v461_v25 = vadd.f32 %v1295_v21, %v460_v24  ;;  %v1383_v26 = vpop.f32.mrb[2].mxu0 }
  0xf0   : > { %v472_v27 = vadd.f32 %v1383_v26, %v1295_v21  ;;  %v463_v28 = vpop.f32.mrb[3].mxu0  ;;  %v525_v30 = vmax.f32 %v469_v23, 0.0 }
  0xf1   : > { %v464_v29 = vadd.f32 %v1295_v21, %v463_v28  ;;  %v523_v32 = vmax.f32 %v461_v25, 0.0 }
  0xf2   : > { %v526_v31 = vmax.f32 %v472_v27, 0.0 }
  0xf3   : > { %v524_v33 = vmax.f32 %v464_v29, 0.0 }
  0xf4   : > { %v540_v34 = vpack.c.bf16 %v526_v31, %v525_v30 }
  0xf5   : > { %v1386_v35 = vpop.f32.mrb[4].mxu0  ;;  %v539_v36 = vpack.c.bf16 %v524_v33, %v523_v32 }
  0xf6   : > { %v485_v37 = vadd.f32 %v1386_v35, %v1295_v21  ;;  %v476_v38 = vpop.f32.mrb[5].mxu0 }
  0xf7   : > { %v477_v39 = vadd.f32 %v1295_v21, %v476_v38  ;;  %v1387_v40 = vpop.f32.mrb[6].mxu0  ;;  %1412 = vmatprep.mubr.bf16.mxu1 %v539_v36 }
  0xf8   : > { %v488_v41 = vadd.f32 %v1387_v40, %v1295_v21  ;;  %v479_v42 = vpop.f32.mrb[7].mxu0  ;;  %1413 = vmatmul.mubr.bf16.vlgmr.msra.gmra.mrb[0].mxu1 %v540_v34  ;;  %v529_v44 = vmax.f32 %v485_v37, 0.0 }
  0xf9   : > { %v480_v43 = vadd.f32 %v1295_v21, %v479_v42  ;;  %v527_v46 = vmax.f32 %v477_v39, 0.0 }
  0xfa   : > { %v530_v45 = vmax.f32 %v488_v41, 0.0 }
  0xfb   : > { %v528_v47 = vmax.f32 %v480_v43, 0.0 }
  0xfc   : > { %v542_v48 = vpack.c.bf16 %v530_v45, %v529_v44 }
  0xfd   : > { %v541_v49 = vpack.c.bf16 %v528_v47, %v527_v46  ;;  %v1390_v50 = vpop.f32.mrb[8].mxu0 }
  0xfe   : > { %v501_v51 = vadd.f32 %v1390_v50, %v1295_v21  ;;  %v492_v52 = vpop.f32.mrb[9].mxu0 }
  0xff   : > { %v493_v53 = vadd.f32 %v1295_v21, %v492_v52  ;;  %v1391_v54 = vpop.f32.mrb[10].mxu0  ;;  %1416 = vmatprep.mubr.bf16.mxu1 %v541_v49 }
 0x100   : > { %v533_v55 = vmax.f32 %v501_v51, 0.0  ;;  %v504_v56 = vadd.f32 %v1391_v54, %v1295_v21  ;;  %v495_v57 = vpop.f32.mrb[11].mxu0  ;;  %1417 = vmatmul.mubr.bf16.gmra.mrb[4].mxu1 %v542_v48 }
 0x101   : > { %v531_v58 = vmax.f32 %v493_v53, 0.0  ;;  %v496_v59 = vadd.f32 %v1295_v21, %v495_v57 }
 0x102   : > { %v534_v60 = vmax.f32 %v504_v56, 0.0 }
 0x103   : > { %v532_v61 = vmax.f32 %v496_v59, 0.0 }
 0x104   : > { %v544_v62 = vpack.c.bf16 %v534_v60, %v533_v55 }
 0x105   : > { %v543_v63 = vpack.c.bf16 %v532_v61, %v531_v58  ;;  %v1394_v0 = vpop.f32.mrb[12].mxu0 }
 0x106   : > { %v517_v1 = vadd.f32 %v1394_v0, %v1295_v21  ;;  %v508_v2 = vpop.f32.mrb[13].mxu0 }
 0x107   : > { %v509_v3 = vadd.f32 %v1295_v21, %v508_v2  ;;  %v1395_v4 = vpop.f32.mrb[14].mxu0  ;;  %1420 = vmatprep.mubr.bf16.mxu1 %v543_v63 }
 0x108   : > { %v537_v5 = vmax.f32 %v517_v1, 0.0  ;;  %v520_v6 = vadd.f32 %v1395_v4, %v1295_v21  ;;  %v511_v7 = vpop.f32.mrb[15].mxu0  ;;  %1421 = vmatmul.mubr.bf16.gmra.mrb[8].mxu1 %v544_v62 }
 0x109   : > { %v535_v8 = vmax.f32 %v509_v3, 0.0  ;;  %v512_v9 = vadd.f32 %v1295_v21, %v511_v7 }
 0x10a   : > { %v538_v10 = vmax.f32 %v520_v6, 0.0 }
 0x10b   : > { %v536_v11 = vmax.f32 %v512_v9, 0.0 }
 0x10c   : > { %v546_v12 = vpack.c.bf16 %v538_v10, %v537_v5 }
 0x10d   : > { %v545_v13 = vpack.c.bf16 %v536_v11, %v535_v8  ;;  %v1829_v11 = vld [vmem:[%s2181_s6] ss:$0 sm:$0xff] }
 0x10f   : > { %1424 = vmatprep.mubr.bf16.mxu1 %v545_v13 }
 0x110   : > { %1425 = vmatmul.mubr.bf16.gmra.mrb[12].mxu1 %v546_v12 }
 0x1cb   : > { %v1414_v19 = vpop.f32.mrb[0].mxu1 }
 0x1cc   : > { %v661_v20 = vadd.f32 %v1414_v19, %v1313_v18  ;;  %v652_v21 = vpop.f32.mrb[1].mxu1 }
 0x1cd   : > { %v653_v22 = vadd.f32 %v1313_v18, %v652_v21  ;;  %v1415_v23 = vpop.f32.mrb[2].mxu1 }
 0x1ce   : > { %1528 = vtanh.f32 %v661_v20  ;;  %v664_v24 = vadd.f32 %v1415_v23, %v1313_v18  ;;  %v655_v25 = vpop.f32.mrb[3].mxu1 }
 0x1cf   : > { %1530 = vtanh.f32 %v653_v22  ;;  %v656_v26 = vadd.f32 %v1313_v18, %v655_v25 }
 0x1d0   : > { %1532 = vtanh.f32 %v664_v24 }
 0x1d1   : > { %1534 = vtanh.f32 %v656_v26  ;;  %v1657_v26 = vmov 0.0  }
 0x1d2   : > { %1067 = vst [vmem:[%s1855_s17] sm:$0xff] %v1657_v26  ;;  %1068 = vst [vmem:[%s1855_s17 + $0x8] sm:$0xff] %v1657_v26 }
 0x1d3   : > { %v1418_v27 = vpop.f32.mrb[4].mxu1  ;;  %1069 = vst [vmem:[%s1855_s17 + $0x10] sm:$0xff] %v1657_v26  ;;  %1070 = vst [vmem:[%s1855_s17 + $0x18] sm:$0xff] %v1657_v26 }
 0x1d4   : > { %v677_v28 = vadd.f32 %v1418_v27, %v1313_v18  ;;  %v668_v29 = vpop.f32.mrb[5].mxu1  ;;  %1071 = vst [vmem:[%s1855_s17 + $0x20] sm:$0xff] %v1657_v26  ;;  %1072 = vst [vmem:[%s1855_s17 + $0x28] sm:$0xff] %v1657_v26 }
 0x1d5   : > { %v669_v30 = vadd.f32 %v1313_v18, %v668_v29  ;;  %v1419_v31 = vpop.f32.mrb[6].mxu1  ;;  %1073 = vst [vmem:[%s1855_s17 + $0x30] sm:$0xff] %v1657_v26  ;;  %1074 = vst [vmem:[%s1855_s17 + $0x38] sm:$0xff] %v1657_v26 }
 0x1d6   : > { %1536 = vtanh.f32 %v677_v28  ;;  %v680_v32 = vadd.f32 %v1419_v31, %v1313_v18  ;;  %v671_v33 = vpop.f32.mrb[7].mxu1  ;;  %1075 = vst [vmem:[%s1855_s17 + $0x40] sm:$0xff] %v1657_v26  ;;  %1076 = vst [vmem:[%s1855_s17 + $0x48] sm:$0xff] %v1657_v26 }
 0x1d7   : > { %1538 = vtanh.f32 %v669_v30  ;;  %v672_v34 = vadd.f32 %v1313_v18, %v671_v33  ;;  %1077 = vst [vmem:[%s1855_s17 + $0x50] sm:$0xff] %v1657_v26  ;;  %1078 = vst [vmem:[%s1855_s17 + $0x58] sm:$0xff] %v1657_v26 }
 0x1d8   : > { %v1529_v35 = vpop.eup %1528  ;;  %1540 = vtanh.f32 %v680_v32  ;;  %1079 = vst [vmem:[%s1855_s17 + $0x60] sm:$0xff] %v1657_v26  ;;  %1080 = vst [vmem:[%s1855_s17 + $0x68] sm:$0xff] %v1657_v26 }
 0x1d9   : > { %v1531_v36 = vpop.eup %1530  ;;  %1542 = vtanh.f32 %v672_v34  ;;  %1081 = vst [vmem:[%s1855_s17 + $0x70] sm:$0xff] %v1657_v26  ;;  %1082 = vst [vmem:[%s1855_s17 + $0x78] sm:$0xff] %v1657_v26 }
 0x1da   : > { %v1533_v37 = vpop.eup %1532 }
 0x1db   : > { %v1535_v38 = vpop.eup %1534  ;;  %v1422_v39 = vpop.f32.mrb[8].mxu1  ;;  %v732_v40 = vpack.c.bf16 %v1533_v37, %v1529_v35 }
 0x1dc   : > { %v693_v41 = vadd.f32 %v1422_v39, %v1313_v18  ;;  %v684_v42 = vpop.f32.mrb[9].mxu1  ;;  %v731_v43 = vpack.c.bf16 %v1535_v38, %v1531_v36 }
 0x1dd   : > { %v685_v44 = vadd.f32 %v1313_v18, %v684_v42  ;;  %v1423_v45 = vpop.f32.mrb[10].mxu1 }
 0x1de   : > { %1544 = vtanh.f32 %v693_v41  ;;  %v696_v46 = vadd.f32 %v1423_v45, %v1313_v18  ;;  %v687_v47 = vpop.f32.mrb[11].mxu1  ;;  %1444 = vmatprep.mubr.bf16.mxu0 %v731_v43 }
 0x1df   : > { %1546 = vtanh.f32 %v685_v44  ;;  %v688_v48 = vadd.f32 %v1313_v18, %v687_v47  ;;  %1445 = vmatmul.mubr.bf16.vlgmr.msra.gmra.mrb[16].mxu0 %v732_v40 }
 0x1e0   : > { %v1537_v49 = vpop.eup %1536  ;;  %1548 = vtanh.f32 %v696_v46 }
 0x1e1   : > { %v1539_v50 = vpop.eup %1538  ;;  %1550 = vtanh.f32 %v688_v48 }
 0x1e2   : > { %v1541_v51 = vpop.eup %1540 }
 0x1e3   : > { %v1543_v52 = vpop.eup %1542  ;;  %v1426_v53 = vpop.f32.mrb[12].mxu1  ;;  %v734_v54 = vpack.c.bf16 %v1541_v51, %v1537_v49 }
 0x1e4   : > { %v709_v55 = vadd.f32 %v1426_v53, %v1313_v18  ;;  %v700_v56 = vpop.f32.mrb[13].mxu1  ;;  %v733_v57 = vpack.c.bf16 %v1543_v52, %v1539_v50 }
 0x1e5   : > { %v701_v58 = vadd.f32 %v1313_v18, %v700_v56  ;;  %v1427_v59 = vpop.f32.mrb[14].mxu1 }
 0x1e6   : > { %1552 = vtanh.f32 %v709_v55  ;;  %v712_v60 = vadd.f32 %v1427_v59, %v1313_v18  ;;  %v703_v61 = vpop.f32.mrb[15].mxu1  ;;  %1448 = vmatprep.mubr.bf16.mxu0 %v733_v57 }
 0x1e7   : > { %1554 = vtanh.f32 %v701_v58  ;;  %v704_v62 = vadd.f32 %v1313_v18, %v703_v61  ;;  %1449 = vmatmul.mubr.bf16.gmra.mrb[20].mxu0 %v734_v54 }
 0x1e8   : > { %v1545_v63 = vpop.eup %1544  ;;  %1556 = vtanh.f32 %v712_v60 }
 0x1e9   : > { %v1547_v0 = vpop.eup %1546  ;;  %1558 = vtanh.f32 %v704_v62 }
 0x1ea   : > { %v1549_v1 = vpop.eup %1548 }
 0x1eb   : > { %v1551_v2 = vpop.eup %1550  ;;  %v736_v3 = vpack.c.bf16 %v1549_v1, %v1545_v63 }
 0x1ec   : > { %v735_v4 = vpack.c.bf16 %v1551_v2, %v1547_v0 }
 0x1ee   : > { %1452 = vmatprep.mubr.bf16.mxu0 %v735_v4 }
 0x1ef   : > { %1453 = vmatmul.mubr.bf16.gmra.mrb[24].mxu0 %v736_v3 }
 0x1f0   : > { %v1553_v5 = vpop.eup %1552 }
 0x1f1   : > { %v1555_v6 = vpop.eup %1554 }
 0x1f2   : > { %v1557_v7 = vpop.eup %1556 }
 0x1f3   : > { %v1559_v8 = vpop.eup %1558  ;;  %v738_v9 = vpack.c.bf16 %v1557_v7, %v1553_v5 }
 0x1f4   : > { %v737_v10 = vpack.c.bf16 %v1559_v8, %v1555_v6 }
 0x1f6   : > { %1456 = vmatprep.mubr.bf16.mxu0 %v737_v10 }
 0x1f7   : > { %1457 = vmatmul.mubr.bf16.gmra.mrb[28].mxu0 %v738_v9 }
 0x2b2   : > { %v1446_v12 = vpop.f32.mrb[16].mxu0 }
 0x2b3   : > { %v1832_v13 = vadd.f32 %v1446_v12, %v1829_v11  ;;  %v844_v14 = vpop.f32.mrb[17].mxu0 }
 0x2b4   : > { %v1835_v15 = vadd.f32 %v1829_v11, %v844_v14  ;;  %v1447_v16 = vpop.f32.mrb[18].mxu0 }
 0x2b5   : > { %v909_v17 = vmul.f32 0.5, %v1832_v13  ;;  %v1839_v18 = vadd.f32 %v1447_v16, %v1829_v11  ;;  %1120 = vrot.lane.b32.xlu0 %v1832_v13, %s1656_s26  ;;  %v847_v19 = vpop.f32.mrb[19].mxu0 }
 0x2b6   : > { %v907_v20 = vmul.f32 0.5, %v1835_v15  ;;  %v1851_v24 = vadd.f32 %v1829_v11, %v847_v19 }
 0x2b7   : > { %1122 = vrot.lane.b32.xlu1 %v1839_v18, %s1656_s26  ;;  %v927_v21 = vmul.f32 1.442695, %v909_v17  ;;  %v910_v23 = vmul.f32 0.5, %v1839_v18 }
 0x2b8   : > { %v923_v22 = vmul.f32 1.442695, %v907_v20  ;;  %v908_v33 = vmul.f32 0.5, %v1851_v24 }
 0x2b9   : > { %1116 = vrot.lane.b32.xlu0 %v1835_v15, %s1656_s26  ;;  %v929_v29 = vmul.f32 1.442695, %v910_v23 }
 0x2ba   : > { %1560 = vpow2.f32 %v923_v22  ;;  %v1450_v25 = vpop.f32.mrb[20].mxu0  ;;  %v925_v36 = vmul.f32 1.442695, %v908_v33 }
 0x2bb   : > { %v1874_v27 = vadd.f32 %v1450_v25, %v1829_v11  ;;  %v860_v28 = vpop.f32.mrb[21].mxu0  ;;  %1118 = vrot.lane.b32.xlu1 %v1851_v24, %s1656_s26  ;;  %1562 = vpow2.f32 %v927_v21 }
 0x2bc   : > { %v1451_v30 = vpop.f32.mrb[22].mxu0  ;;  %v1885_v34 = vadd.f32 %v1829_v11, %v860_v28  ;;  %1564 = vpow2.f32 %v929_v29 }
 0x2bd   : > { %v1879_v31 = vadd.f32 %v1451_v30, %v1829_v11  ;;  %v863_v32 = vpop.f32.mrb[23].mxu0  ;;  %1128 = vrot.lane.b32.xlu0 %v1874_v27, %s1656_s26  ;;  %v913_v37 = vmul.f32 0.5, %v1874_v27  ;;  %1566 = vpow2.f32 %v925_v36 }
 0x2be   : > { %v1890_v35 = vadd.f32 %v1829_v11, %v863_v32  ;;  %v911_v46 = vmul.f32 0.5, %v1885_v34 }
 0x2bf   : > { %1130 = vrot.lane.b32.xlu1 %v1879_v31, %s1656_s26  ;;  %v914_v41 = vmul.f32 0.5, %v1879_v31  ;;  %v935_v45 = vmul.f32 1.442695, %v913_v37 }
 0x2c0   : > { %v912_v49 = vmul.f32 0.5, %v1890_v35  ;;  %v931_v52 = vmul.f32 1.442695, %v911_v46 }
 0x2c1   : > { %1124 = vrot.lane.b32.xlu0 %v1885_v34, %s1656_s26  ;;  %v937_v48 = vmul.f32 1.442695, %v914_v41  ;;  %1568 = vpow2.f32 %v935_v45  ;;  %v955_v45 = vld [vmem:[%s1968_s22] sm:$0xff] }
 0x2c2   : > { %v1454_v38 = vpop.f32.mrb[24].mxu0  ;;  %v933_v57 = vmul.f32 1.442695, %v912_v49 }
 0x2c3   : > { %v876_v39 = vpop.f32.mrb[25].mxu0  ;;  %1126 = vrot.lane.b32.xlu1 %v1890_v35, %s1656_s26  ;;  %v1901_v47 = vadd.f32 %v1454_v38, %v1829_v11  ;;  %1570 = vpow2.f32 %v937_v48  ;;  %v957_v48 = vld [vmem:[%s1968_s22 + $0x10] sm:$0xff] }
 0x2c4   : > { %v1561_v40 = vpop.eup %1560  ;;  %v1455_v42 = vpop.f32.mrb[26].mxu0  ;;  %v1912_v54 = vadd.f32 %v1829_v11, %v876_v39  ;;  %1572 = vpow2.f32 %v931_v52 }
 0x2c5   : > { %v879_v43 = vpop.f32.mrb[27].mxu0  ;;  %987 = vrot.lane.b32.xlu0 %v1561_v40, %s1658_s18  ;;  %v1563_v44 = vpop.eup %1562  ;;  %v1906_v50 = vadd.f32 %v1455_v42, %v1829_v11  ;;  %v917_v53 = vmul.f32 0.5, %v1901_v47  ;;  %1574 = vpow2.f32 %v933_v57 }
 0x2c6   : > { %v1565_v51 = vpop.eup %1564  ;;  %v1917_v59 = vadd.f32 %v1829_v11, %v879_v43  ;;  %v915_v63 = vmul.f32 0.5, %v1912_v54 }
 0x2c7   : > { %991 = vrot.lane.b32.xlu1 %v1563_v44, %s1658_s18  ;;  %v918_v58 = vmul.f32 0.5, %v1906_v50  ;;  %v943_v62 = vmul.f32 1.442695, %v917_v53  ;;  %v1567_v1 = vpop.eup %1566 }
 0x2c8   : > { %v916_v3 = vmul.f32 0.5, %v1917_v59  ;;  %v939_v5 = vmul.f32 1.442695, %v915_v63 }
 0x2c9   : > { %1136 = vrot.lane.b32.xlu0 %v1901_v47, %s1656_s26  ;;  %v945_v2 = vmul.f32 1.442695, %v918_v58  ;;  %1576 = vpow2.f32 %v943_v62  ;;  %v956_v62 = vld [vmem:[%s1968_s22 + $0x8] sm:$0xff] }
 0x2ca   : > { %v1458_v55 = vpop.f32.mrb[28].mxu0  ;;  %v941_v9 = vmul.f32 1.442695, %v916_v3  ;;  %v961_v3 = vld [vmem:[%s1968_s22 + $0x30] sm:$0xff] }
 0x2cb   : > { %v892_v56 = vpop.f32.mrb[29].mxu0  ;;  %993 = vrot.lane.b32.xlu1 %v1565_v51, %s1658_s18  ;;  %v1923_v0 = vadd.f32 %v1458_v55, %v1829_v11  ;;  %v1569_v8 = vpop.eup %1568  ;;  %1578 = vpow2.f32 %v945_v2 }
 0x2cc   : > { %v1459_v60 = vpop.f32.mrb[30].mxu0  ;;  %v1934_v7 = vadd.f32 %v1829_v11, %v892_v56  ;;  %1580 = vpow2.f32 %v939_v5  ;;  %v958_v56 = vld [vmem:[%s1968_s22 + $0x18] sm:$0xff] }
 0x2cd   : > { %v895_v61 = vpop.f32.mrb[31].mxu0  ;;  %1132 = vrot.lane.b32.xlu0 %v1912_v54, %s1656_s26  ;;  %v1929_v4 = vadd.f32 %v1459_v60, %v1829_v11  ;;  %v921_v6 = vmul.f32 0.5, %v1923_v0  ;;  %v1571_v14 = vpop.eup %1570  ;;  %1582 = vpow2.f32 %v941_v9 }
 0x2ce   : > { %v1940_v12 = vadd.f32 %v1829_v11, %v895_v61  ;;  %v919_v17 = vmul.f32 0.5, %v1934_v7  ;;  %v1573_v19 = vpop.eup %1572 }
 0x2cf   : > { %1138 = vrot.lane.b32.xlu1 %v1906_v50, %s1656_s26  ;;  %v922_v10 = vmul.f32 0.5, %v1929_v4  ;;  %v951_v16 = vmul.f32 1.442695, %v921_v6  ;;  %v1575_v22 = vpop.eup %1574  ;;  %v962_v6 = vld [vmem:[%s1968_s22 + $0x38] sm:$0xff] }
 0x2d0   : > { %v920_v21 = vmul.f32 0.5, %v1940_v12  ;;  %v947_v11 = vmul.f32 1.442695, %v919_v17  ;;  %v960_v17 = vld [vmem:[%s1968_s22 + $0x28] sm:$0xff] }
 0x2d1   : > { %989 = vrot.lane.b32.xlu0 %v1567_v1, %s1658_s18  ;;  %v953_v20 = vmul.f32 1.442695, %v922_v10  ;;  %1584 = vpow2.f32 %v951_v16  ;;  %v959_v10 = vld [vmem:[%s1968_s22 + $0x20] sm:$0xff] }
 0x2d2   : > { %v949_v25 = vmul.f32 1.442695, %v920_v21 }
 0x2d3   : > { %1134 = vrot.lane.b32.xlu1 %v1917_v59, %s1656_s26  ;;  %v1577_v23 = vpop.eup %1576  ;;  %1586 = vpow2.f32 %v953_v20 }
 0x2d4   : > { %1588 = vpow2.f32 %v947_v11 }
 0x2d5   : > { %999 = vrot.lane.b32.xlu0 %v1569_v8, %s1658_s18  ;;  %v1579_v26 = vpop.eup %1578  ;;  %1590 = vpow2.f32 %v949_v25 }
 0x2d6   : > { %v1581_v28 = vpop.eup %1580 }
 0x2d7   : > { %1001 = vrot.lane.b32.xlu1 %v1571_v14, %s1658_s18  ;;  %v1583_v29 = vpop.eup %1582 }
 0x2d9   : > { %995 = vrot.lane.b32.xlu0 %v1573_v19, %s1658_s18 }
 0x2db   : > { %997 = vrot.lane.b32.xlu1 %v1575_v22, %s1658_s18  ;;  %v1585_v30 = vpop.eup %1584  ;;  %v965_v22 = vld [vmem:[%s1968_s22 + $0x50] sm:$0xff] }
 0x2dd   : > { %1007 = vrot.lane.b32.xlu0 %v1577_v23, %s1658_s18  ;;  %v1587_v32 = vpop.eup %1586  ;;  %v966_v23 = vld [vmem:[%s1968_s22 + $0x58] sm:$0xff] }
 0x2de   : > { %v1589_v33 = vpop.eup %1588 }
 0x2df   : > { %1009 = vrot.lane.b32.xlu1 %v1579_v26, %s1658_s18  ;;  %v1591_v36 = vpop.eup %1590 }
 0x2e1   : > { %1003 = vrot.lane.b32.xlu0 %v1581_v28, %s1658_s18  ;;  %v963_v28 = vld [vmem:[%s1968_s22 + $0x40] sm:$0xff] }
 0x2e3   : > { %1005 = vrot.lane.b32.xlu1 %v1583_v29, %s1658_s18 }
 0x2e5   : > { %1015 = vrot.lane.b32.xlu0 %v1585_v30, %s1658_s18 }
 0x2e7   : > { %1017 = vrot.lane.b32.xlu1 %v1587_v32, %s1658_s18  ;;  %v964_v32 = vld [vmem:[%s1968_s22 + $0x48] sm:$0xff] }
 0x2e9   : > { %1011 = vrot.lane.b32.xlu0 %v1589_v33, %s1658_s18 }
 0x2eb   : > { %1013 = vrot.lane.b32.xlu1 %v1591_v36, %s1658_s18  ;;  %s1592_s18 = scalar_lea.vmem %s2125_s23, 2048 }
 0x2ec   : > { %p1593_p11 = scmp.ne.s32.totalorder %s2125_s23, %s1592_s18  ;;  %p1600_p1 = scmp.lt.s32.totalorder %s1598_s21, %s1592_s18 }
 0x2ed   : > { %1140 = vrot.lane.b32.xlu0 %v1934_v7, %s1656_s26 }
 0x2ee   : > { %p1594_p12 = pnand %p1593_p11, %p1744_p5  ;;  %p1601_p2 = por %p1600_p1, %p1599_p0 }
 0x2ef   : > { %1142 = vrot.lane.b32.xlu1 %v1940_v12, %s1656_s26 }
 0x2f0   : > { %p1595_p13 = pneg %p1594_p12 }
 0x2f1   : > { %1144 = vrot.lane.b32.xlu0 %v1923_v0, %s1656_s26 }
 0x2f2   : > { %p1602_p3 = pnand %p1601_p2, %p1595_p13 }
 0x2f3   : > { %1146 = vrot.lane.b32.xlu1 %v1929_v4, %s1656_s26 }
 0x327   : > { %v1121_v37 = vpop.permute.xlu0 %1120 }
 0x329   : > { %v1123_v38 = vpop.permute.xlu1 %1122 }
 0x32b   : > { %v1117_v39 = vpop.permute.xlu0 %1116 }
 0x32d   : > { %v1119_v40 = vpop.permute.xlu1 %1118 }
 0x32f   : > { %v1129_v41 = vpop.permute.xlu0 %1128 }
 0x331   : > { %v1131_v42 = vpop.permute.xlu1 %1130 }
 0x333   : > { %v1970_v43 = vpop.permute.xlu0 %1124 }
 0x335   : > { %v1972_v44 = vpop.permute.xlu1 %1126 }
 0x337   : > { %v988_v46 = vpop.permute.xlu0 %987 }
 0x338   : > { %v1035_v49 = vmul.f32 %v988_v46, %v955_v45  ;;  %v968_v46 = vld [vmem:[%s1968_s22 + $0x68] sm:$0xff] }
 0x339   : > { %v992_v51 = vpop.permute.xlu1 %991 }
 0x33a   : > { %v1051_v52 = vadd.f32 %v1035_v49, %v1835_v15  ;;  %v1037_v53 = vmul.f32 %v992_v51, %v957_v48 }
 0x33b   : > { %v1977_v55 = vpop.permute.xlu0 %1136 }
 0x33c   : > { %1084 = vst.msk [vmem:[%s1855_s17] sm:$0xff] %vm1083_vm1, %v1051_v52  ;;  %v1053_v57 = vadd.f32 %v1037_v53, %v1832_v13 }
 0x33d   : > { %1165 = vst.msk [vmem:[%s1855_s17] sm:$0xff] %vm1164_vm2, %v1117_v39  ;;  %v994_v58 = vpop.permute.xlu1 %993 }
 0x33e   : > { %1182 = vst.msk [vmem:[%s1855_s17] sm:$0xff] %vm1181_vm3, %v1117_v39  ;;  %v1038_v15 = vmul.f32 %v994_v58, %v958_v56 }
 0x33f   : > { %1086 = vst.msk [vmem:[%s1855_s17 + $0x10] sm:$0xff] %vm1083_vm1, %v1053_v57  ;;  %v1991_v60 = vpop.permute.xlu0 %1132 }
 0x340   : > { %1167 = vst.msk [vmem:[%s1855_s17 + $0x10] sm:$0xff] %vm1164_vm2, %v1121_v37  ;;  %v1054_v13 = vadd.f32 %v1038_v15, %v1839_v18 }
 0x341   : > { %1184 = vst.msk [vmem:[%s1855_s17 + $0x10] sm:$0xff] %vm1181_vm3, %v1121_v37  ;;  %v1996_v61 = vpop.permute.xlu1 %1138  ;;  %v969_v37 = vld [vmem:[%s1968_s22 + $0x70] sm:$0xff] }
 0x342   : > { %1087 = vst.msk [vmem:[%s1855_s17 + $0x18] sm:$0xff] %vm1083_vm1, %v1054_v13 }
 0x343   : > { %1168 = vst.msk [vmem:[%s1855_s17 + $0x18] sm:$0xff] %vm1164_vm2, %v1123_v38  ;;  %v990_v63 = vpop.permute.xlu0 %989 }
 0x344   : > { %1185 = vst.msk [vmem:[%s1855_s17 + $0x18] sm:$0xff] %vm1181_vm3, %v1123_v38  ;;  %v1036_v1 = vmul.f32 %v990_v63, %v956_v62 }
 0x345   : > { %v2005_v2 = vpop.permute.xlu1 %1134 }
 0x346   : > { %v1052_v18 = vadd.f32 %v1036_v1, %v1851_v24 }
 0x347   : > { %v1000_v5 = vpop.permute.xlu0 %999 }
 0x348   : > { %1085 = vst.msk [vmem:[%s1855_s17 + $0x8] sm:$0xff] %vm1083_vm1, %v1052_v18  ;;  %v1041_v8 = vmul.f32 %v1000_v5, %v961_v3 }
 0x349   : > { %1166 = vst.msk [vmem:[%s1855_s17 + $0x8] sm:$0xff] %vm1164_vm2, %v1119_v40  ;;  %v1002_v9 = vpop.permute.xlu1 %1001 }
 0x34a   : > { %1183 = vst.msk [vmem:[%s1855_s17 + $0x8] sm:$0xff] %vm1181_vm3, %v1119_v40  ;;  %v1057_v14 = vadd.f32 %v1041_v8, %v1874_v27  ;;  %v1042_v24 = vmul.f32 %v1002_v9, %v962_v6  ;;  %v970_v40 = vld [vmem:[%s1968_s22 + $0x78] sm:$0xff] }
 0x34b   : > { %v996_v16 = vpop.permute.xlu0 %995 }
 0x34c   : > { %1090 = vst.msk [vmem:[%s1855_s17 + $0x30] sm:$0xff] %vm1083_vm1, %v1057_v14  ;;  %v1058_v19 = vadd.f32 %v1042_v24, %v1879_v31  ;;  %v1039_v20 = vmul.f32 %v996_v16, %v959_v10 }
 0x34d   : > { %1171 = vst.msk [vmem:[%s1855_s17 + $0x30] sm:$0xff] %vm1164_vm2, %v1129_v41  ;;  %v998_v21 = vpop.permute.xlu1 %997 }
 0x34e   : > { %1188 = vst.msk [vmem:[%s1855_s17 + $0x30] sm:$0xff] %vm1181_vm3, %v1129_v41  ;;  %v1055_v27 = vadd.f32 %v1039_v20, %v1885_v34  ;;  %v1040_v11 = vmul.f32 %v998_v21, %v960_v17 }
 0x34f   : > { %1091 = vst.msk [vmem:[%s1855_s17 + $0x38] sm:$0xff] %vm1083_vm1, %v1058_v19  ;;  %v1008_v31 = vpop.permute.xlu0 %1007 }
 0x350   : > { %1172 = vst.msk [vmem:[%s1855_s17 + $0x38] sm:$0xff] %vm1164_vm2, %v1131_v42  ;;  %v1056_v25 = vadd.f32 %v1040_v11, %v1890_v35  ;;  %v1045_v26 = vmul.f32 %v1008_v31, %v965_v22 }
 0x351   : > { %1189 = vst.msk [vmem:[%s1855_s17 + $0x38] sm:$0xff] %vm1181_vm3, %v1131_v42  ;;  %v1010_v34 = vpop.permute.xlu1 %1009 }
 0x352   : > { %1088 = vst.msk [vmem:[%s1855_s17 + $0x20] sm:$0xff] %vm1083_vm1, %v1055_v27  ;;  %1089 = vst.msk [vmem:[%s1855_s17 + $0x28] sm:$0xff] %vm1083_vm1, %v1056_v25  ;;  %v1061_v29 = vadd.f32 %v1045_v26, %v1901_v47  ;;  %v1046_v30 = vmul.f32 %v1010_v34, %v966_v23 }
 0x353   : > { %1169 = vst.msk [vmem:[%s1855_s17 + $0x20] sm:$0xff] %vm1164_vm2, %v1970_v43  ;;  %1170 = vst.msk [vmem:[%s1855_s17 + $0x28] sm:$0xff] %vm1164_vm2, %v1972_v44  ;;  %v1004_v35 = vpop.permute.xlu0 %1003 }
 0x354   : > { %1186 = vst.msk [vmem:[%s1855_s17 + $0x20] sm:$0xff] %vm1181_vm3, %v1970_v43  ;;  %1187 = vst.msk [vmem:[%s1855_s17 + $0x28] sm:$0xff] %vm1181_vm3, %v1972_v44  ;;  %v1062_v33 = vadd.f32 %v1046_v30, %v1906_v50  ;;  %v1043_v36 = vmul.f32 %v1004_v35, %v963_v28  ;;  %v967_v43 = vld [vmem:[%s1968_s22 + $0x60] sm:$0xff] }
 0x355   : > { %1094 = vst.msk [vmem:[%s1855_s17 + $0x50] sm:$0xff] %vm1083_vm1, %v1061_v29  ;;  %v1006_v47 = vpop.permute.xlu1 %1005 }
 0x356   : > { %1175 = vst.msk [vmem:[%s1855_s17 + $0x50] sm:$0xff] %vm1164_vm2, %v1977_v55  ;;  %v1059_v38 = vadd.f32 %v1043_v36, %v1912_v54  ;;  %v1044_v39 = vmul.f32 %v1006_v47, %v964_v32 }
 0x357   : > { %1192 = vst.msk [vmem:[%s1855_s17 + $0x50] sm:$0xff] %vm1181_vm3, %v1977_v55  ;;  %v1016_v50 = vpop.permute.xlu0 %1015 }
 0x358   : > { %1095 = vst.msk [vmem:[%s1855_s17 + $0x58] sm:$0xff] %vm1083_vm1, %v1062_v33  ;;  %1092 = vst.msk [vmem:[%s1855_s17 + $0x40] sm:$0xff] %vm1083_vm1, %v1059_v38  ;;  %v1060_v41 = vadd.f32 %v1044_v39, %v1917_v59  ;;  %v1049_v42 = vmul.f32 %v1016_v50, %v969_v37 }
 0x359   : > { %1176 = vst.msk [vmem:[%s1855_s17 + $0x58] sm:$0xff] %vm1164_vm2, %v1996_v61  ;;  %1173 = vst.msk [vmem:[%s1855_s17 + $0x40] sm:$0xff] %vm1164_vm2, %v1991_v60  ;;  %v1018_v54 = vpop.permute.xlu1 %1017 }
 0x35a   : > { %1193 = vst.msk [vmem:[%s1855_s17 + $0x58] sm:$0xff] %vm1181_vm3, %v1996_v61  ;;  %1190 = vst.msk [vmem:[%s1855_s17 + $0x40] sm:$0xff] %vm1181_vm3, %v1991_v60  ;;  %v1065_v44 = vadd.f32 %v1049_v42, %v1923_v0  ;;  %v1050_v45 = vmul.f32 %v1018_v54, %v970_v40 }
 0x35b   : > { %1093 = vst.msk [vmem:[%s1855_s17 + $0x48] sm:$0xff] %vm1083_vm1, %v1060_v41  ;;  %v1012_v59 = vpop.permute.xlu0 %1011 }
 0x35c   : > { %1174 = vst.msk [vmem:[%s1855_s17 + $0x48] sm:$0xff] %vm1164_vm2, %v2005_v2  ;;  %v1066_v48 = vadd.f32 %v1050_v45, %v1929_v4  ;;  %v1047_v0 = vmul.f32 %v1012_v59, %v967_v43 }
 0x35d   : > { %1191 = vst.msk [vmem:[%s1855_s17 + $0x48] sm:$0xff] %vm1181_vm3, %v2005_v2  ;;  %v1014_v49 = vpop.permute.xlu1 %1013 }
 0x35e   : > { %1098 = vst.msk [vmem:[%s1855_s17 + $0x70] sm:$0xff] %vm1083_vm1, %v1065_v44  ;;  %1099 = vst.msk [vmem:[%s1855_s17 + $0x78] sm:$0xff] %vm1083_vm1, %v1066_v48  ;;  %v1063_v51 = vadd.f32 %v1047_v0, %v1934_v7  ;;  %v1048_v52 = vmul.f32 %v1014_v49, %v968_v46 }
 0x35f   : > { %v1141_v53 = vpop.permute.xlu0 %1140 }
 0x360   : > { %1096 = vst.msk [vmem:[%s1855_s17 + $0x60] sm:$0xff] %vm1083_vm1, %v1063_v51  ;;  %v1064_v55 = vadd.f32 %v1048_v52, %v1940_v12 }
 0x361   : > { %1177 = vst.msk [vmem:[%s1855_s17 + $0x60] sm:$0xff] %vm1164_vm2, %v1141_v53  ;;  %v1143_v4 = vpop.permute.xlu1 %1142 }
 0x362   : > { %1097 = vst.msk [vmem:[%s1855_s17 + $0x68] sm:$0xff] %vm1083_vm1, %v1064_v55 }
 0x363   : > { %1194 = vst.msk [vmem:[%s1855_s17 + $0x60] sm:$0xff] %vm1181_vm3, %v1141_v53  ;;  %v1145_v7 = vpop.permute.xlu0 %1144 }
 0x364   : > { %1178 = vst.msk [vmem:[%s1855_s17 + $0x68] sm:$0xff] %vm1164_vm2, %v1143_v4  ;;  %1179 = vst.msk [vmem:[%s1855_s17 + $0x70] sm:$0xff] %vm1164_vm2, %v1145_v7 }
 0x365   : > { %1195 = vst.msk [vmem:[%s1855_s17 + $0x68] sm:$0xff] %vm1181_vm3, %v1143_v4  ;;  %1196 = vst.msk [vmem:[%s1855_s17 + $0x70] sm:$0xff] %vm1181_vm3, %v1145_v7  ;;  %v1147_v12 = vpop.permute.xlu1 %1146 }
 0x366   : > { %1180 = vst.msk [vmem:[%s1855_s17 + $0x78] sm:$0xff] %vm1164_vm2, %v1147_v12 }
 0x367   : > { %1197 = vst.msk [vmem:[%s1855_s17 + $0x78] sm:$0xff] %vm1181_vm3, %v1147_v12 }
 0x368   : > { %1605 = shalt.err (!%p1602_p3)
}
 0x369   : > { %s1606_s12 = scalar_lea.hbm %s2121_s13, 2048  ;;  %s1610_s19 = scalar_lea.hbm %s2183_s8, 4096 }
 0x36a   : > { %p1607_p4 = scmp.ne.s32.totalorder %s2121_s13, %s1606_s12  ;;  %p1611_p9 = scmp.lt.u32.totalorder %s2121_s13, %s2183_s8 }
 0x36b   : > { %p1612_p10 = scmp.lt.u32.totalorder %s1610_s19, %s1606_s12  ;;  %p1614_p12 = scmp.lt.u32.totalorder %s1606_s12, %s2121_s13 }
 0x36c   : > { %p1608_p7 = pnand %p1607_p4, %p1744_p5 }
 0x36d   : > { %p1613_p11 = por %p1612_p10, %p1611_p9 }
 0x36e   : > { %p1609_p8 = pneg %p1608_p7 }
 0x36f   : > { %p1615_p13 = por %p1614_p12, %p1613_p11 }
 0x371   : > { %p1616_p0 = pnand %p1615_p13, %p1609_p8 }
 0x373   : > { %1619 = shalt.err (!%p1616_p0)
}
 0x374   : > { %s1660_s18 = smov 128  }
 0x375   : > { %1460 = dma.vmem_to_hbm [thread:$0]  (%p1744_p5), %s2125_s23, 2048, %s2121_s13, %s2133_s9, %s1660_s18, %s1660_s18, %s1656_s26  }
 0x376 PF: > { %p1466_p1 = scmp.ge.s32.totalorder %s1654_s30, 2  ;;  %s1227_s10 = sand.u32 1, %s1642_s27  }
 0x377   : > { %s1228_s20 = scalar_lea.sflag [#allocation3], %s1227_s10 }
 0x378   : > { %p1463_p2 = pnand %p1466_p1, %p1748_p6 }
 0x37a   : > { %1637 = dma.done.wait (!%p1463_p2), %s1228_s20, 2048  }
 0x37b   : > { %1639 = vsyncadd (!%p1463_p2), %s1228_s20, 4294965248  ;;  %p18_p3 = scmp.ge.s32.totalorder %s1731_s11, 4   ;;  %s2186_s27 = smov %s1646_s28 }
 0x37c   : > { %s2187_s28 = smov %s1650_s29  ;;  %s2188_s29 = smov %s1742_s14 }
 0x37d   : > { %s2189_s30 = smov %s1731_s11  ;;  %20 = sbr.rel (!%p18_p3) target bundleno = 3 (0x3), region = 90 }
 0x384   :  { %1233 = vsyncpa [#allocation3], 1 }
 0x385   :  { %1235 = vsyncpa [#allocation3 + $0x1], 1 }

</bundles_post_ra>
